<compile_context>
chip_gen: v5e
topology: v5e:2x2
jax: 0.10.0
libtpu: 0.0.40
codegen_flags: <defaults>
</compile_context>

<pallas_src>
import numpy as np
import jax
import jax.numpy as jnp
from jax.experimental import pallas as pl
from jax.experimental.pallas import tpu as pltpu


def as_list(obj):
    return obj if isinstance(obj, list) else [obj]


def reduce_list(obj):
    return obj[0] if isinstance(obj, list) and len(obj) == 1 else obj


def _round_up(x, m):
    return (x + m - 1) // m * m


def _tap_offsets(k):
    p = k // 2
    return [(dd, dh, dw)
            for dd in range(-p, p + 1)
            for dh in range(-p, p + 1)
            for dw in range(-p, p + 1)]


def _make_tap_masks(s, k, cin_pad, b_tile):
    """(k^3*cin_pad, b_tile*s^3) f32 validity mask.

    Row t*cin_pad+c carries tap t's mask (1 where the tap stays inside the s^3
    volume, 0 where the cyclic lane roll wrapped into 'same' padding or the
    neighbouring batch lane block).  Pre-replicated host-side over channels and
    batch tiles so the kernel applies ONE fused elementwise multiply to the
    whole patch slab (no per-tap sublane broadcasts).
    """
    d, h, w = np.meshgrid(np.arange(s), np.arange(s), np.arange(s), indexing="ij")
    rows = []
    for dd, dh, dw in _tap_offsets(k):
        ok = ((d + dd >= 0) & (d + dd < s) & (h + dh >= 0) & (h + dh < s)
              & (w + dw >= 0) & (w + dw < s))
        rows.append(ok.reshape(-1).astype(np.float32))
    base = np.stack(rows, 0)                         # (k^3, s^3)
    m = np.repeat(base, cin_pad, axis=0)             # (k^3*cin_pad, s^3)
    return np.tile(m, (1, b_tile))                   # (k^3*cin_pad, b_tile*s^3)


def _make_pool_matrix(s, p):
    """(s^3, (s/p)^3) average-pool matrix mapping flat DHW -> flat pooled DHW."""
    so = s // p
    m = np.zeros((s ** 3, so ** 3), np.float32)
    inv = 1.0 / float(p ** 3)
    for d in range(s):
        for h in range(s):
            for w in range(s):
                pin = (d * s + h) * s + w
                q = ((d // p) * so + (h // p)) * so + (w // p)
                m[pin, q] = inv
    return m


def _conv_weight_matrix(w, cin_pad):
    """(Cout, Cin, K, K, K) torch-layout conv weight -> (Cout, K^3*cin_pad)
    im2col matrix, tap-major / channel-minor, channels zero-padded to cin_pad
    (matches the patch-slab rows built in the kernel)."""
    cout, cin, k, _, _ = w.shape
    wt = np.transpose(w, (0, 2, 3, 4, 1))            # (Cout, K, K, K, Cin)
    if cin_pad > cin:
        pad = np.zeros(wt.shape[:-1] + (cin_pad - cin,), wt.dtype)
        wt = np.concatenate([wt, pad], axis=-1)
    return wt.reshape(cout, k ** 3 * cin_pad)


def _const_spec(arr):
    """BlockSpec for a grid-invariant operand (same block every step).
    TODO(synk): add pipeline_mode=pl.Buffered(1) for VMEM headroom at scale."""
    nd = arr.ndim

    def imap(n):
        return (0,) * nd

    return pl.BlockSpec(arr.shape, imap)


# --------------------------- roll-convention probe ---------------------------
_ROLL_SIGN = None


def _roll_sign():
    """+1 if pltpu.roll(x, s, axis)[j] == x[j+s], -1 if == x[j-s] (jnp.roll style).
    Self-calibrated once with a tiny probe kernel so the im2col lane rotations
    are correct under either convention."""
    global _ROLL_SIGN
    if _ROLL_SIGN is None:
        def probe(x_ref, o_ref):
            o_ref[...] = pltpu.roll(x_ref[...], 1, axis=1)

        x = jax.lax.broadcasted_iota(jnp.float32, (8, 128), 1)
        out = pl.pallas_call(
            probe, out_shape=jax.ShapeDtypeStruct((8, 128), jnp.float32))(x)
        # jnp.roll style: out[0] = in[-1] = 127 ;  reversed style: out[0] = in[1] = 1
        _ROLL_SIGN = -1 if float(out[0, 0]) > 64.0 else 1
    return _ROLL_SIGN


# ---------------------------------------------------------------------------
# GridEncoder: parameters + fused Pallas forward
# ---------------------------------------------------------------------------

class GridEncoderPallas:
    def __init__(self, key, n_channels, grid_size=8, n_filters=8, width_factor=2,
                 n_levels=2, conv_per_level=2, kernel_size=3, relu_leak=0.1,
                 pool_type='a', pool_factor=2, n_output=1, init_conv_pool=False,
                 block_type='c', batch_tile=2):
        assert block_type == 'c', "only plain conv blocks implemented"
        assert pool_type == 'a', "only average pooling implemented"
        self.relu_leak = float(relu_leak)
        self.pool_factor = pool_factor
        self.n_channels = n_channels
        self.grid_size = grid_size
        self.input_grid_size = grid_size
        self.b_tile = int(batch_tile)
        self._key = key
        self.roll_sign = _roll_sign()

        def new_key():
            self._key, sub = jax.random.split(self._key)
            return sub

        self.conv_layers = []     # dicts: w (bf16 im2col), b, w_orig, b_orig, cin, cin_pad, cout, k, s
        self.pool_layers = []     # dicts: s, p
        self.feature_shapes = []  # (C, S) after each conv block
        self.plan = []            # ('conv', i) | ('pool', i) | ('feature', i)

        def add_conv(cin, cout, k):
            fan_in = cin * k ** 3
            w = jax.random.normal(new_key(), (cout, cin, k, k, k),
                                  jnp.float32) / np.sqrt(fan_in)
            b = 0.01 * jax.random.normal(new_key(), (cout,), jnp.float32)
            cin_pad = _round_up(cin, 8)
            w_mat = jnp.asarray(_conv_weight_matrix(np.asarray(w), cin_pad),
                                dtype=jnp.bfloat16)          # bf16 MXU operand
            self.conv_layers.append(dict(
                w=w_mat, b=jnp.reshape(b, (cout, 1)), w_orig=w, b_orig=b,
                cin=cin, cin_pad=cin_pad, cout=cout, k=k, s=self.grid_size))
            self.plan.append(('conv', len(self.conv_layers) - 1))
            self.n_channels = cout

        def add_pool(p):
            assert self.grid_size % p == 0, (self.grid_size, p)
            self.pool_layers.append(dict(s=self.grid_size, p=p))
            self.plan.append(('pool', len(self.pool_layers) - 1))
            self.grid_size //= p

        def add_feature():
            self.plan.append(('feature', len(self.feature_shapes)))
            self.feature_shapes.append((self.n_channels, self.grid_size))

        if init_conv_pool:
            add_conv(self.n_channels, n_filters, kernel_size + 2)
            add_feature()
            add_pool(pool_factor)
            n_filters *= width_factor

        for i in range(n_levels):
            if i > 0:
                add_pool(pool_factor)
                n_filters *= width_factor
            for _ in range(conv_per_level):
                add_conv(self.n_channels, n_filters, kernel_size)
            add_feature()

        # ---------------- FC heads (Grid2Vec) ----------------
        n_output = as_list(n_output)
        assert n_output and all(n_o > 0 for n_o in n_output)
        self.tasks = []
        c_f, s_f = self.n_channels, self.grid_size
        dhw_f = s_f ** 3
        n_input = c_f * dhw_f
        for n_o in n_output:
            w = jax.random.normal(new_key(), (n_o, n_input),
                                  jnp.float32) / np.sqrt(n_input)
            b = 0.01 * jax.random.normal(new_key(), (n_o,), jnp.float32)
            # (n_o, C, DHW) tiled over the batch lane blocks -> (n_o, C, B*DHW)
            w_t = np.tile(np.asarray(w).reshape(n_o, c_f, dhw_f), (1, 1, self.b_tile))
            self.tasks.append(dict(
                w=jnp.asarray(w_t), b=jnp.reshape(b, (n_o, 1)),
                w_orig=w, b_orig=b, n_o=n_o))

        # per-batch lane selector for the head (B*DHW_f, B): 1 inside batch block b
        sel = np.zeros((self.b_tile * dhw_f, self.b_tile), np.float32)
        for bb in range(self.b_tile):
            sel[bb * dhw_f:(bb + 1) * dhw_f, bb] = 1.0
        self.head_sel = jnp.asarray(sel)

        # shared constant operands (per distinct configuration)
        self.mask_keys = sorted({(l['s'], l['k'], l['cin_pad']) for l in self.conv_layers})
        self.masks = {kk: jnp.asarray(_make_tap_masks(kk[0], kk[1], kk[2], self.b_tile))
                      for kk in self.mask_keys}
        self.pool_keys = sorted({(pp['s'], pp['p']) for pp in self.pool_layers})
        self.pool_mats = {kk: jnp.asarray(_make_pool_matrix(*kk), dtype=jnp.bfloat16)
                          for kk in self.pool_keys}

        # shared VMEM scratch sizing (im2col patch slab)
        self.patch_rows = max(l['k'] ** 3 * l['cin_pad'] for l in self.conv_layers)
        self.patch_cols = max(self.b_tile * l['s'] ** 3 for l in self.conv_layers)

    # ----------------------------- fused forward -----------------------------

    def __call__(self, x_ncdhw):
        N, C, D, H, W = x_ncdhw.shape
        assert D == H == W == self.input_grid_size
        first = self.conv_layers[0]
        assert C == first['cin']
        B = self.b_tile

        # pad batch up to a multiple of the batch tile (padded rows are dropped)
        n_pad = _round_up(N, B)
        if n_pad > N:
            x_ncdhw = jnp.concatenate(
                [x_ncdhw,
                 jnp.zeros((n_pad - N,) + x_ncdhw.shape[1:], x_ncdhw.dtype)], axis=0)
        nb = n_pad // B

        cin_pad0 = first['cin_pad']
        s0 = self.input_grid_size
        dhw0 = s0 ** 3

        # NCDHW -> (NB, C, B*DHW) lane-concatenated slabs (one-time host layout
        # plumbing so every kernel load/store is lane-dense)
        xf = (x_ncdhw.reshape(nb, B, C, dhw0)
              .transpose(0, 2, 1, 3)
              .reshape(nb, C, B * dhw0)
              .astype(jnp.float32))
        if cin_pad0 > C:
            xf = jnp.pad(xf, ((0, 0), (0, cin_pad0 - C), (0, 0)))

        conv_layers = self.conv_layers
        pool_layers = self.pool_layers
        tasks = self.tasks
        plan = list(self.plan)
        feature_shapes = list(self.feature_shapes)
        mask_keys = list(self.mask_keys)
        pool_keys = list(self.pool_keys)
        mask_index = {kk: i for i, kk in enumerate(mask_keys)}
        pool_index = {kk: i for i, kk in enumerate(pool_keys)}
        n_conv, n_mask = len(conv_layers), len(mask_keys)
        n_poolm, n_task, n_feat = len(pool_keys), len(tasks), len(feature_shapes)
        relu_leak = self.relu_leak
        roll_sign = self.roll_sign

        # ------------------------- inputs & specs -------------------------
        inputs = [xf]
        in_specs = [pl.BlockSpec((None, cin_pad0, B * dhw0), lambda n: (n, 0, 0))]
        for layer in conv_layers:
            inputs += [layer['w'], layer['b']]
            in_specs += [_const_spec(layer['w']), _const_spec(layer['b'])]
        for kk in mask_keys:
            inputs.append(self.masks[kk])
            in_specs.append(_const_spec(self.masks[kk]))
        for kk in pool_keys:
            inputs.append(self.pool_mats[kk])
            in_specs.append(_const_spec(self.pool_mats[kk]))
        inputs.append(self.head_sel)
        in_specs.append(_const_spec(self.head_sel))
        for task in tasks:
            inputs += [task['w'], task['b']]
            in_specs += [_const_spec(task['w']), _const_spec(task['b'])]

        # ------------------------- outputs -------------------------
        out_shapes, out_specs = [], []
        for task in tasks:
            out_shapes.append(jax.ShapeDtypeStruct((nb, task['n_o'], B), jnp.float32))
            out_specs.append(pl.BlockSpec((None, task['n_o'], B), lambda n: (n, 0, 0)))
        for (c, s) in feature_shapes:
            out_shapes.append(jax.ShapeDtypeStruct((nb, c, B * s ** 3), jnp.float32))
            out_specs.append(pl.BlockSpec((None, c, B * s ** 3), lambda n: (n, 0, 0)))

        scratch_shapes = [
            pltpu.VMEM((self.patch_rows, self.patch_cols), jnp.float32),  # im2col patches
        ]

        # ------------------------- fused kernel -------------------------
        def kernel(*refs):
            pos = 0
            x_ref = refs[pos]; pos += 1
            conv_refs = []
            for _ in range(n_conv):
                conv_refs.append((refs[pos], refs[pos + 1])); pos += 2
            mask_refs = list(refs[pos:pos + n_mask]); pos += n_mask
            pool_refs = list(refs[pos:pos + n_poolm]); pos += n_poolm
            sel_ref = refs[pos]; pos += 1
            task_refs = []
            for _ in range(n_task):
                task_refs.append((refs[pos], refs[pos + 1])); pos += 2
            out_refs = list(refs[pos:pos + n_task]); pos += n_task
            feat_refs = list(refs[pos:pos + n_feat]); pos += n_feat
            patches_ref = refs[pos]

            act = x_ref[...]                                 # (cin_pad0, B*DHW0) f32

            for op, idx in plan:
                if op == 'conv':
                    meta = conv_layers[idx]
                    w_ref, b_ref = conv_refs[idx]
                    s, k, cin_pad = meta['s'], meta['k'], meta['cin_pad']
                    dhw, hw = s ** 3, s * s
                    ncols = B * dhw
                    rows = k ** 3 * cin_pad
                    m_ref = mask_refs[mask_index[(s, k, cin_pad)]]

                    # static channel pad to a sublane multiple (not hit by this
                    # config; weights are zero for padded channels).
                    if act.shape[0] < cin_pad:
                        act = jnp.concatenate(
                            [act, jnp.zeros((cin_pad - act.shape[0], ncols), act.dtype)],
                            axis=0)

                    # im2col: K^3 cyclic lane rotations (XLU), 128-aligned stores.
                    for t, (dd, dh, dw) in enumerate(_tap_offsets(k)):
                        off = dd * hw + dh * s + dw
                        shift = (roll_sign * off) % ncols
                        if shift == 0:
                            piece = act
                        else:
                            piece = pltpu.roll(act, shift, axis=1)
                        patches_ref[t * cin_pad:(t + 1) * cin_pad, 0:ncols] = piece

                    # ONE fused mask multiply (kills wrapped lanes), bf16 cast,
                    # then a single native-bf16 MXU matmul with f32 accumulation.
                    # (Only the window written above is read back -> no stale data.)
                    patches = (patches_ref[0:rows, 0:ncols]
                               * m_ref[...]).astype(jnp.bfloat16)
                    acc = jnp.dot(w_ref[...], patches,
                                  preferred_element_type=jnp.float32) + b_ref[...]
                    act = jnp.maximum(acc, relu_leak * acc)   # LeakyReLU, 2 VALU ops

                elif op == 'pool':
                    meta = pool_layers[idx]
                    pm_ref = pool_refs[pool_index[(meta['s'], meta['p'])]]
                    dhw_in = meta['s'] ** 3
                    a16 = act.astype(jnp.bfloat16)
                    pooled = [jnp.dot(a16[:, b * dhw_in:(b + 1) * dhw_in], pm_ref[...],
                                      preferred_element_type=jnp.float32)
                              for b in range(B)]
                    act = jnp.concatenate(pooled, axis=1)     # stays lane-dense

                else:  # 'feature': lane-dense (C, B*DHW) block write
                    feat_refs[idx][...] = act

            # Grid2Vec heads: torch flatten order (C, D, H, W) == act's (C, DHW)
            # layout per batch block.  One VPU multiply + one MXU dot against the
            # per-batch lane selector + a tiny sublane sum per output.
            for ti, task in enumerate(tasks):
                fw_ref, fb_ref = task_refs[ti]
                for o in range(task['n_o']):
                    prod = act * fw_ref[o]                              # (C, B*dhw_f)
                    per_batch = jnp.dot(prod, sel_ref[...],
                                        preferred_element_type=jnp.float32)  # (C, B)
                    out_refs[ti][o:o + 1, :] = (
                        jnp.sum(per_batch, axis=0, keepdims=True) + fb_ref[o:o + 1, :])

        fused = pl.pallas_call(
            kernel,
            out_shape=tuple(out_shapes),
            grid=(nb,),
            in_specs=in_specs,
            out_specs=tuple(out_specs),
            scratch_shapes=scratch_shapes,
            compiler_params=pltpu.CompilerParams(
                dimension_semantics=("parallel",),      # batch tiles shard across TCs
                vmem_limit_bytes=32 * 1024 * 1024),
        )
        results = fused(*inputs)
        if not isinstance(results, (list, tuple)):
            results = [results]
        results = list(results)

        outputs = []
        for i, task in enumerate(tasks):
            r = results[i]                                           # (nb, n_o, B)
            outputs.append(r.transpose(0, 2, 1).reshape(n_pad, task['n_o'])[:N])
        conv_features = []
        for f, (c, s) in zip(results[n_task:], feature_shapes):
            f = f.reshape(nb, c, B, s, s, s).transpose(0, 2, 1, 3, 4, 5)
            conv_features.append(f.reshape(n_pad, c, s, s, s)[:N])
        return reduce_list(outputs), conv_features

    # ----------------------- pure-JAX reference (validation) -----------------------

    def reference_forward(self, x_ncdhw):
        act = x_ncdhw.astype(jnp.float32)
        feats = []
        for op, idx in self.plan:
            if op == 'conv':
                l = self.conv_layers[idx]
                act = jax.lax.conv_general_dilated(
                    act, l['w_orig'], window_strides=(1, 1, 1), padding='SAME',
                    dimension_numbers=('NCDHW', 'OIDHW', 'NCDHW'),
                    precision=jax.lax.Precision.HIGHEST)
                act = act + l['b_orig'].reshape(1, -1, 1, 1, 1)
                act = jnp.where(act >= 0, act, self.relu_leak * act)
            elif op == 'pool':
                p = self.pool_layers[idx]['p']
                n, c, d, h, w = act.shape
                act = act.reshape(n, c, d // p, p, h // p, p, w // p, p).mean(axis=(3, 5, 7))
            else:
                feats.append(act)
        n = act.shape[0]
        flat = act.reshape(n, -1)
        outs = [jnp.dot(flat, t['w_orig'].T, precision=jax.lax.Precision.HIGHEST)
                + t['b_orig'] for t in self.tasks]
        return reduce_list(outs), feats


# ---------------------------------------------------------------------------

if __name__ == "__main__":
    key = jax.random.PRNGKey(0)
    k_param, k_data = jax.random.split(key)

    # N=4 with batch_tile=2 -> grid=(2,): both v7x TensorCores get work.
    N, C, G = 4, 4, 8
    x = jax.random.normal(k_data, (N, C, G, G, G), jnp.float32)   # NCDHW

    enc = GridEncoderPallas(
        k_param, n_channels=C, grid_size=G, n_filters=8, width_factor=2,
        n_levels=2, conv_per_level=2, kernel_size=3, relu_leak=0.1,
        pool_type='a', pool_factor=2, n_output=1, batch_tile=2)

    out, feats = enc(x)
    out = jax.block_until_ready(out)
    for f in feats:
        jax.block_until_ready(f)

    assert out.shape == (N, 1), out.shape
    assert feats[0].shape == (N, 8, G, G, G), feats[0].shape
    assert feats[1].shape == (N, 16, G // 2, G // 2, G // 2), feats[1].shape
    assert bool(jnp.all(jnp.isfinite(out)))

    # sanity check against a full-precision plain-JAX reference of the same
    # module/parameters (tolerance covers the deliberate bf16 MXU inputs)
    ref_out, ref_feats = enc.reference_forward(x)
    np.testing.assert_allclose(np.asarray(out), np.asarray(ref_out),
                               rtol=5e-2, atol=5e-2)
    for f, rf in zip(feats, ref_feats):
        np.testing.assert_allclose(np.asarray(f), np.asarray(rf),
                                   rtol=5e-2, atol=5e-2)

    print("KERNEL_OK")
</pallas_src>

<mosaic_0001>
module attributes {stable_mosaic.version = 11 : i64} {
  func.func @probe(%arg0: memref<8x128xf32, #tpu.memory_space<vmem>>, %arg1: memref<8x128xf32, #tpu.memory_space<vmem>>) attributes {dimension_semantics = [], scalar_prefetch = 0 : i64, scratch_operands = 0 : i64, tpu.core_type = #tpu.core_type<tc>} {
    %c0 = arith.constant 0 : index
    %c0_0 = arith.constant 0 : index
    %0 = vector.load %arg0[%c0, %c0_0] : memref<8x128xf32, #tpu.memory_space<vmem>>, vector<8x128xf32>
    %c1_i32 = arith.constant 1 : i32
    %1 = tpu.dynamic_rotate %0 by %c1_i32 dim 1 : vector<8x128xf32>, i32 -> vector<8x128xf32>
    %c0_1 = arith.constant 0 : index
    %c0_2 = arith.constant 0 : index
    %2 = vector.load %arg1[%c0_1, %c0_2] : memref<8x128xf32, #tpu.memory_space<vmem>>, vector<8x128xf32>
    tpu.vector_store %arg1[%c0_1, %c0_2], %1 {strides = array<i32>} : memref<8x128xf32, #tpu.memory_space<vmem>>, vector<8x128xf32>,
    return
  }
}

</mosaic_0001>

<bundles_post_ra>
// kernel: tpu_custom_call.1
= control target key start
LH: loop header
LB: loop body
LE: loop exit
PB: predicated region body
PF: predicated region fallthrough
CT: control target
= control target key end

     0   :  { %6 = vsyncpa [#allocation3], 0  ;;  %s118_s0 = inlined_call_operand.hbm [shape: f32[8,128], index: 0, kind: input, shape index: {}]   ;;  %s119_s1 = inlined_call_operand.hbm [shape: f32[8,128], index: 1, kind: output, shape index: {}]  }
   0x1   :  { %7 = vsyncpa [#allocation4], 0  ;;  %s13_s8 = sshll.u32 %s118_s0, 4  ;;  %s99_s9 = smov [#allocation2]   ;;  %s14_s8 = int_to_ptr.hbm [resolvable:$true] %s13_s8 }
   0x2   :  { %s15_s10 = sshll.u32 %s99_s9, 4  ;;  %s16_s10 = int_to_ptr.vmem [resolvable:$true] %s15_s10 }
   0x3   :  { %18 = dma.hbm_to_vmem [thread:$0]  %s14_s8, 128, %s16_s10, [#allocation3]  }
   0x4   :  { %95 = dma.done.wait [#allocation3], 128  }
   0x5   :  { %96 = vsyncadd [#allocation3], 4294967168  ;;  %v23_v0 = vld [vmem:[#allocation2] sm:$0xff]  ;;  %s100_s11 = smov 1   ;;  %s101_s12 = smov [#allocation5]  }
   0x6   :  { %24 = vrot.lane.b32.xlu0 %v23_v0, %s100_s11  ;;  %s32_s13 = sshll.u32 %s101_s12, 4  ;;  %s34_s16 = sshll.u32 %s119_s1, 4  ;;  %s33_s13 = int_to_ptr.vmem [resolvable:$true] %s32_s13  ;;  %s35_s16 = int_to_ptr.hbm [resolvable:$true] %s34_s16 }
  0x78   :  { %v25_v1 = vpop.permute.xlu0 %24 }
  0x79   :  { %26 = vst [vmem:[#allocation5] sm:$0xff] %v25_v1 }
  0x7a   :  { %37 = dma.vmem_to_hbm [thread:$0]  %s33_s13, 128, %s35_s16, [#allocation4]  }
  0x7b   :  { %97 = dma.done.wait [#allocation4], 128  }
  0x7c   :  { %98 = vsyncadd [#allocation4], 4294967168 }
  0x7d   :  { %42 = vsyncpa [#allocation3], 1 }
  0x7e   :  { %43 = vsyncpa [#allocation4], 1 }

</bundles_post_ra>
